<compile_context>
chip_gen: v5e
topology: v5e:2x2
jax: 0.10.0
libtpu: 0.0.40
codegen_flags: <defaults>
</compile_context>

<pallas_src>
import functools
import math

import jax
import jax.numpy as jnp
from jax.experimental import pallas as pl
from jax.experimental.pallas import tpu as pltpu


# Large finite negative bias: exp() underflows to exactly 0 (same result as
# masked_fill(-finfo.max) whenever >=1 key is valid) and avoids NaN for
# fully-masked rows.
_MASK_NEG = -1e9

# Conservative tile caps (sized for v7x's smaller VMEM; also fine on v5e/v6e).
_ROW_TILE = 256
_COL_TILE = 512
_Q_TILE = 256
_LN_EPS = 1e-5


# ---------------------------------------------------------------------------
# Pallas kernels
# ---------------------------------------------------------------------------
def _ln_rows(x_ref, g_ref, b_ref):
    """LayerNorm over the last (feature) axis of a full-width row tile, f32."""
    x = x_ref[...].astype(jnp.float32)
    mu = jnp.mean(x, axis=-1, keepdims=True)
    xc = x - mu
    var = jnp.mean(xc * xc, axis=-1, keepdims=True)
    return xc * jax.lax.rsqrt(var + _LN_EPS) * g_ref[...] + b_ref[...]


def _matmul_kernel(a_ref, w_ref, o_ref):
    a = a_ref[...].astype(jnp.bfloat16)
    w = w_ref[...].astype(jnp.bfloat16)
    o_ref[...] = jnp.dot(a, w, preferred_element_type=jnp.float32).astype(o_ref.dtype)


def _ln_matmul_kernel(x_ref, g_ref, b_ref, w_ref, o_ref):
    # Fused LayerNorm + (no-bias) linear:  (LN(x)) @ W
    h = _ln_rows(x_ref, g_ref, b_ref).astype(jnp.bfloat16)
    w = w_ref[...].astype(jnp.bfloat16)
    o_ref[...] = jnp.dot(h, w, preferred_element_type=jnp.float32).astype(o_ref.dtype)


def _matmul_bias_res_kernel(a_ref, w_ref, b_ref, r_ref, o_ref):
    # Linear + bias + residual add fused in one pass (no extra HBM round trip).
    a = a_ref[...].astype(jnp.bfloat16)
    w = w_ref[...].astype(jnp.bfloat16)
    acc = jnp.dot(a, w, preferred_element_type=jnp.float32) + b_ref[...]
    o_ref[...] = (acc + r_ref[...].astype(jnp.float32)).astype(o_ref.dtype)


def _ln_geglu_kernel(x_ref, g_ref, b_ref, wv_ref, wg_ref, bv_ref, bg_ref, o_ref):
    # Fused LayerNorm + GEGLU: h = LN(x);  (h @ Wv + bv) * gelu(h @ Wg + bg)
    # TODO(synk): PyTorch F.gelu default is exact erf; tanh approximation used here.
    h = _ln_rows(x_ref, g_ref, b_ref).astype(jnp.bfloat16)
    val = jnp.dot(h, wv_ref[...].astype(jnp.bfloat16),
                  preferred_element_type=jnp.float32) + bv_ref[...]
    gate = jnp.dot(h, wg_ref[...].astype(jnp.bfloat16),
                   preferred_element_type=jnp.float32) + bg_ref[...]
    o_ref[...] = (val * jax.nn.gelu(gate, approximate=True)).astype(o_ref.dtype)


def _attn_kernel(q_ref, kv_ref, bias_ref, o_ref, *, heads, dim_head):
    # q_ref:    (1, tq, h*d)   bf16, 1/sqrt(d) already folded into W_q
    # kv_ref:   (1, m, 2*h*d)  bf16, [K | V] along the lane axis
    # bias_ref: (1, 1, m)      f32 additive mask (0 keep, -1e9 masked), shared by heads
    # o_ref:    (1, tq, h*d)   single lane-dense store
    q = q_ref[0]
    kv = kv_ref[0]
    bias = bias_ref[0]                     # (1, m), broadcasts over queries
    inner = heads * dim_head
    outs = []
    for hh in range(heads):                # static unroll over heads
        lo = hh * dim_head
        qh = q[:, lo:lo + dim_head]
        kh = kv[:, lo:lo + dim_head]
        vh = kv[:, inner + lo:inner + lo + dim_head]
        # trans_b matmul: contract last dims, no explicit k.T / XLU transpose.
        sim = jax.lax.dot_general(qh, kh, (((1,), (1,)), ((), ())),
                                  preferred_element_type=jnp.float32)
        sim = sim + bias
        sim = sim - jnp.max(sim, axis=-1, keepdims=True)
        p = jnp.exp(sim)
        l = jnp.sum(p, axis=-1, keepdims=True)
        oh = jnp.dot(p.astype(jnp.bfloat16), vh, preferred_element_type=jnp.float32)
        outs.append(oh * pl.reciprocal(l, approx=True))
    o_ref[0] = jnp.concatenate(outs, axis=-1).astype(o_ref.dtype)


# ---------------------------------------------------------------------------
# pallas_call wrappers
# ---------------------------------------------------------------------------
def _tile(dim, cap):
    return dim if dim <= cap else cap


def _linear(x2d, w, bias=None, residual=None, out_dtype=jnp.bfloat16):
    """y = x2d @ w (+ bias + residual), row/col tiled and pipelined."""
    rows, k = x2d.shape
    cols = w.shape[1]
    tm = _tile(rows, _ROW_TILE)
    tn = _tile(cols, _COL_TILE)
    grid = (pl.cdiv(rows, tm), pl.cdiv(cols, tn))
    a_spec = pl.BlockSpec((tm, k), lambda i, j: (i, 0))
    w_spec = pl.BlockSpec((k, tn), lambda i, j: (0, j))
    o_spec = pl.BlockSpec((tm, tn), lambda i, j: (i, j))
    out_shape = jax.ShapeDtypeStruct((rows, cols), out_dtype)
    cparams = pltpu.CompilerParams(dimension_semantics=("parallel", "parallel"))

    if bias is None and residual is None:
        return pl.pallas_call(
            _matmul_kernel, out_shape=out_shape,
            grid_spec=pltpu.PrefetchScalarGridSpec(
                num_scalar_prefetch=0, grid=grid,
                in_specs=[a_spec, w_spec], out_specs=o_spec),
            compiler_params=cparams)(x2d, w)

    b_spec = pl.BlockSpec((1, tn), lambda i, j: (0, j))
    r_spec = pl.BlockSpec((tm, tn), lambda i, j: (i, j))
    return pl.pallas_call(
        _matmul_bias_res_kernel, out_shape=out_shape,
        grid_spec=pltpu.PrefetchScalarGridSpec(
            num_scalar_prefetch=0, grid=grid,
            in_specs=[a_spec, w_spec, b_spec, r_spec], out_specs=o_spec),
        compiler_params=cparams)(x2d, w, bias.reshape(1, cols), residual)


def _ln_linear(x2d, gamma, beta, w, out_dtype=jnp.bfloat16):
    """y = LayerNorm(x2d) @ w, LN fused into the matmul kernel."""
    rows, k = x2d.shape
    cols = w.shape[1]
    tm = _tile(rows, _ROW_TILE)
    tn = _tile(cols, _COL_TILE)
    grid = (pl.cdiv(rows, tm), pl.cdiv(cols, tn))
    return pl.pallas_call(
        _ln_matmul_kernel,
        out_shape=jax.ShapeDtypeStruct((rows, cols), out_dtype),
        grid_spec=pltpu.PrefetchScalarGridSpec(
            num_scalar_prefetch=0, grid=grid,
            in_specs=[pl.BlockSpec((tm, k), lambda i, j: (i, 0)),
                      pl.BlockSpec((1, k), lambda i, j: (0, 0)),
                      pl.BlockSpec((1, k), lambda i, j: (0, 0)),
                      pl.BlockSpec((k, tn), lambda i, j: (0, j))],
            out_specs=pl.BlockSpec((tm, tn), lambda i, j: (i, j))),
        compiler_params=pltpu.CompilerParams(
            dimension_semantics=("parallel", "parallel")),
    )(x2d, gamma.reshape(1, k), beta.reshape(1, k), w)


def _ln_geglu(x2d, gamma, beta, wv, wg, bv, bg):
    """y = GEGLU(LayerNorm(x2d)), LN + both projections + gelu gate fused."""
    rows, k = x2d.shape
    cols = wv.shape[1]
    tm = _tile(rows, _ROW_TILE)
    tn = _tile(cols, _COL_TILE)
    grid = (pl.cdiv(rows, tm), pl.cdiv(cols, tn))
    return pl.pallas_call(
        _ln_geglu_kernel,
        out_shape=jax.ShapeDtypeStruct((rows, cols), jnp.bfloat16),
        grid_spec=pltpu.PrefetchScalarGridSpec(
            num_scalar_prefetch=0, grid=grid,
            in_specs=[pl.BlockSpec((tm, k), lambda i, j: (i, 0)),
                      pl.BlockSpec((1, k), lambda i, j: (0, 0)),
                      pl.BlockSpec((1, k), lambda i, j: (0, 0)),
                      pl.BlockSpec((k, tn), lambda i, j: (0, j)),
                      pl.BlockSpec((k, tn), lambda i, j: (0, j)),
                      pl.BlockSpec((1, tn), lambda i, j: (0, j)),
                      pl.BlockSpec((1, tn), lambda i, j: (0, j))],
            out_specs=pl.BlockSpec((tm, tn), lambda i, j: (i, j))),
        compiler_params=pltpu.CompilerParams(
            dimension_semantics=("parallel", "parallel")),
    )(x2d, gamma.reshape(1, k), beta.reshape(1, k), wv, wg,
      bv.reshape(1, cols), bg.reshape(1, cols))


def _attention(q, kv, bias, heads, dim_head):
    """q: (b, n, h*d) bf16  kv: (b, m, 2*h*d) bf16  bias: (b, 1, m) f32."""
    b, n, inner = q.shape
    m = kv.shape[1]
    two_inner = kv.shape[2]
    tq = _tile(n, _Q_TILE)
    grid = (b, pl.cdiv(n, tq))
    kernel = functools.partial(_attn_kernel, heads=heads, dim_head=dim_head)
    return pl.pallas_call(
        kernel,
        out_shape=jax.ShapeDtypeStruct((b, n, inner), jnp.bfloat16),
        grid_spec=pltpu.PrefetchScalarGridSpec(
            num_scalar_prefetch=0, grid=grid,
            in_specs=[pl.BlockSpec((1, tq, inner), lambda bi, qi: (bi, qi, 0)),
                      pl.BlockSpec((1, m, two_inner), lambda bi, qi: (bi, 0, 0)),
                      pl.BlockSpec((1, 1, m), lambda bi, qi: (bi, 0, 0))],
            out_specs=pl.BlockSpec((1, tq, inner), lambda bi, qi: (bi, qi, 0))),
        compiler_params=pltpu.CompilerParams(
            dimension_semantics=("parallel", "parallel")),
    )(q, kv, bias)


# ---------------------------------------------------------------------------
# Module
# ---------------------------------------------------------------------------
class BasicTransformerBlockPallas:
    """Default-path BasicTransformerBlock (two cross-attentions + GEGLU FF)."""

    def __init__(self, dim, n_heads, d_head, context_dim=None, ff_mult=4,
                 dropout=0.0, key=jax.random.PRNGKey(0)):
        del dropout  # eval-mode: dropout is identity
        self.dim = dim
        self.heads = n_heads
        self.dim_head = d_head
        self.inner = n_heads * d_head
        self.scale = d_head ** (-0.5)
        context_dim = dim if context_dim is None else context_dim
        self.context_dim = context_dim
        ff_inner = dim * ff_mult
        self.ff_inner = ff_inner

        ks = jax.random.split(key, 14)
        bf = jnp.bfloat16

        def w_(k, out_f, in_f):
            bound = 1.0 / math.sqrt(in_f)
            return jax.random.uniform(k, (out_f, in_f), jnp.float32, -bound, bound)

        def b_(k, out_f, in_f):
            bound = 1.0 / math.sqrt(in_f)
            return jax.random.uniform(k, (out_f,), jnp.float32, -bound, bound)

        # --- attn1 --- (scale folded into q weight; k|v fused; stored (in, out) bf16)
        self._wq1 = (w_(ks[0], self.inner, dim).T * self.scale).astype(bf)
        self._wkv1 = jnp.concatenate(
            [w_(ks[1], self.inner, context_dim).T,
             w_(ks[2], self.inner, context_dim).T], axis=1).astype(bf)
        self._wo1 = w_(ks[3], dim, self.inner).T.astype(bf)
        self.bo1 = b_(ks[4], dim, self.inner)
        self.ln1_g = jnp.ones((dim,), jnp.float32)
        self.ln1_b = jnp.zeros((dim,), jnp.float32)

        # --- attn2 ---
        self._wq2 = (w_(ks[5], self.inner, dim).T * self.scale).astype(bf)
        self._wkv2 = jnp.concatenate(
            [w_(ks[6], self.inner, context_dim).T,
             w_(ks[7], self.inner, context_dim).T], axis=1).astype(bf)
        self._wo2 = w_(ks[8], dim, self.inner).T.astype(bf)
        self.bo2 = b_(ks[9], dim, self.inner)
        self.ln2_g = jnp.ones((dim,), jnp.float32)
        self.ln2_b = jnp.zeros((dim,), jnp.float32)

        # --- FeedForward (GEGLU) ---
        w1 = w_(ks[10], 2 * ff_inner, dim).T        # (dim, 2*ff_inner)
        b1 = b_(ks[11], 2 * ff_inner, dim)
        self._ff_wv = w1[:, :ff_inner].astype(bf)
        self._ff_wg = w1[:, ff_inner:].astype(bf)
        self.ff_bv = b1[:ff_inner]
        self.ff_bg = b1[ff_inner:]
        self._ff_w2 = w_(ks[12], dim, ff_inner).T.astype(bf)
        self.ff_b2 = b_(ks[13], dim, ff_inner)
        self.ln3_g = jnp.ones((dim,), jnp.float32)
        self.ln3_b = jnp.zeros((dim,), jnp.float32)
        # TODO(synk): adaln branch, single_attn variant and checkpointing are not
        # implemented (defaults adaln=False, single_attn=False, checkpoint no-op).

    def _attn_block(self, x_res, ctx_bf, bias, ln_g, ln_b, wq, wkv, wo, bo):
        b, n, dim = x_res.shape
        x2d = x_res.reshape(b * n, dim)
        # LayerNorm fused into the Q projection (no standalone LN pass).
        q = _ln_linear(x2d, ln_g, ln_b, wq).reshape(b, n, self.inner)   # bf16
        if ctx_bf is None:
            # Self-attention on the normed hidden (PyTorch default()): fuse the same
            # LN into the KV projection too (LN recompute is cheap VPU filler).
            kv2d, m = _ln_linear(x2d, ln_g, ln_b, wkv), n
        else:
            m = ctx_bf.shape[1]
            kv2d = _linear(ctx_bf.reshape(b * m, -1), wkv)
        kv = kv2d.reshape(b, m, 2 * self.inner)                          # bf16
        a = _attention(q, kv, bias, self.heads, self.dim_head)           # bf16
        out = _linear(a.reshape(b * n, self.inner), wo, bias=bo,
                      residual=x_res.reshape(b * n, dim),
                      out_dtype=jnp.float32)
        return out.reshape(b, n, dim)

    def __call__(self, x, context=None, mask=None):
        b, n, dim = x.shape
        assert dim == self.dim
        m = n if context is None else context.shape[1]
        ctx_bf = None if context is None else context.astype(jnp.bfloat16)
        if mask is None:
            bias = jnp.zeros((b, 1, m), jnp.float32)
        else:
            assert mask.shape == (b, m)
            bias = ((1.0 - mask.astype(jnp.float32)) * _MASK_NEG).reshape(b, 1, m)

        x = self._attn_block(x, ctx_bf, bias, self.ln1_g, self.ln1_b,
                             self._wq1, self._wkv1, self._wo1, self.bo1)
        x = self._attn_block(x, ctx_bf, bias, self.ln2_g, self.ln2_b,
                             self._wq2, self._wkv2, self._wo2, self.bo2)

        # LayerNorm3 fused into the GEGLU kernel; final projection fuses bias+residual.
        g = _ln_geglu(x.reshape(b * n, dim), self.ln3_g, self.ln3_b,
                      self._ff_wv, self._ff_wg, self.ff_bv, self.ff_bg)
        out = _linear(g, self._ff_w2, bias=self.ff_b2,
                      residual=x.reshape(b * n, dim), out_dtype=jnp.float32)
        return out.reshape(b, n, dim)


# ---------------------------------------------------------------------------
# Pure-JAX reference (same math / same bf16 cast points) for verification
# ---------------------------------------------------------------------------
def _reference(mod, x, context=None, mask=None):
    b, n, dim = x.shape
    h, d, inner = mod.heads, mod.dim_head, mod.inner
    bf = jnp.bfloat16
    m = n if context is None else context.shape[1]
    ctx_bf = None if context is None else context.astype(bf)

    def ln(v, g, bta):
        v32 = v.astype(jnp.float32)
        mu = v32.mean(-1, keepdims=True)
        var = ((v32 - mu) ** 2).mean(-1, keepdims=True)
        return ((v32 - mu) * jax.lax.rsqrt(var + _LN_EPS) * g + bta).astype(bf)

    def mm(a, w):
        return jnp.dot(a.astype(bf), w, preferred_element_type=jnp.float32)

    if mask is None:
        bias = jnp.zeros((b, 1, m), jnp.float32)
    else:
        bias = ((1.0 - mask.astype(jnp.float32)) * _MASK_NEG).reshape(b, 1, m)

    def attn(x_res, g_, bta, wq, wkv, wo, bo):
        hq = ln(x_res, g_, bta)
        ctx_l = hq if ctx_bf is None else ctx_bf
        q = mm(hq, wq).astype(bf).reshape(b, n, h, d)
        kv = mm(ctx_l, wkv).astype(bf)
        k4 = kv[..., :inner].reshape(b, m, h, d)
        v4 = kv[..., inner:].reshape(b, m, h, d)
        sim = jnp.einsum("bnhd,bmhd->bhnm", q, k4,
                         preferred_element_type=jnp.float32)
        sim = sim + bias[:, None, :, :]
        sim = sim - sim.max(-1, keepdims=True)
        p = jnp.exp(sim)
        l = p.sum(-1, keepdims=True)                         # (b,h,n,1)
        o = jnp.einsum("bhnm,bmhd->bnhd", p.astype(bf), v4,
                       preferred_element_type=jnp.float32)
        o = (o / jnp.swapaxes(l, 1, 2)).astype(bf).reshape(b, n, inner)
        return mm(o, wo) + bo + x_res.astype(jnp.float32)

    x1 = attn(x, mod.ln1_g, mod.ln1_b, mod._wq1, mod._wkv1, mod._wo1, mod.bo1)
    x2 = attn(x1, mod.ln2_g, mod.ln2_b, mod._wq2, mod._wkv2, mod._wo2, mod.bo2)
    h3 = ln(x2, mod.ln3_g, mod.ln3_b)
    val = mm(h3, mod._ff_wv) + mod.ff_bv
    gate = mm(h3, mod._ff_wg) + mod.ff_bg
    gg = (val * jax.nn.gelu(gate, approximate=True)).astype(bf)
    return mm(gg, mod._ff_w2) + mod.ff_b2 + x2.astype(jnp.float32)


if __name__ == "__main__":
    key = jax.random.PRNGKey(0)
    k_param, k_x, k_ctx, k_mask = jax.random.split(key, 4)

    B, N, M = 2, 16, 8
    DIM, CONTEXT_DIM = 32, 16
    HEADS, DIM_HEAD = 2, 16

    block = BasicTransformerBlockPallas(DIM, HEADS, DIM_HEAD,
                                        context_dim=CONTEXT_DIM, key=k_param)

    x = jax.random.normal(k_x, (B, N, DIM), jnp.float32)
    context = jax.random.normal(k_ctx, (B, M, CONTEXT_DIM), jnp.float32)
    mask = jax.random.uniform(k_mask, (B, M)) > 0.3
    mask = mask.at[:, 0].set(True)   # ensure at least one valid key per row

    # --- cross-attention path (context + mask) ---
    out = jax.block_until_ready(block(x, context=context, mask=mask))
    ref = _reference(block, x, context=context, mask=mask)
    assert out.shape == (B, N, DIM)
    max_err = float(jnp.max(jnp.abs(out - ref)))
    # Tolerance absorbs bf16 MXU operands + approx reciprocal (both mirrored in the
    # reference); structural bugs would show up as O(1) errors.
    assert jnp.allclose(out, ref, atol=5e-2, rtol=5e-2), f"cross mismatch: {max_err}"

    # --- self-attention path (context=None, exercises LN-fused KV projection) ---
    self_block = BasicTransformerBlockPallas(DIM, HEADS, DIM_HEAD, key=k_param)
    out2 = jax.block_until_ready(self_block(x))
    ref2 = _reference(self_block, x)
    max_err2 = float(jnp.max(jnp.abs(out2 - ref2)))
    assert jnp.allclose(out2, ref2, atol=5e-2, rtol=5e-2), f"self mismatch: {max_err2}"

    print("KERNEL_OK")
</pallas_src>

<mosaic_0001>
module attributes {stable_mosaic.version = 11 : i64} {
  func.func @_ln_matmul_kernel(%arg0: i32, %arg1: i32, %arg2: memref<32x32xf32, #tpu.memory_space<vmem>>, %arg3: memref<1x32xf32, #tpu.memory_space<vmem>>, %arg4: memref<1x32xf32, #tpu.memory_space<vmem>>, %arg5: memref<32x32xbf16, #tpu.memory_space<vmem>>, %arg6: memref<32x32xbf16, #tpu.memory_space<vmem>>) attributes {dimension_semantics = [#tpu.dimension_semantics<parallel>, #tpu.dimension_semantics<parallel>], iteration_bounds = array<i64: 1, 1>, scalar_prefetch = 0 : i64, scratch_operands = 0 : i64, tpu.core_type = #tpu.core_type<tc>, window_params = [{transform_indices = @transform_0, window_bounds = array<i64: 32, 32>}, {pipeline_mode = #tpu.pipeline_mode<synchronous>, transform_indices = @transform_1, window_bounds = array<i64: 1, 32>}, {pipeline_mode = #tpu.pipeline_mode<synchronous>, transform_indices = @transform_2, window_bounds = array<i64: 1, 32>}, {transform_indices = @transform_3, window_bounds = array<i64: 32, 32>}, {transform_indices = @transform_4, window_bounds = array<i64: 32, 32>}]} {
    %c0 = arith.constant 0 : index
    %c0_0 = arith.constant 0 : index
    %0 = vector.load %arg2[%c0, %c0_0] : memref<32x32xf32, #tpu.memory_space<vmem>>, vector<32x32xf32>
    %cst = arith.constant dense<0.000000e+00> : vector<32xf32>
    %1 = vector.multi_reduction <add>, %0, %cst [1] : vector<32x32xf32> to vector<32xf32>
    %2 = vector.shape_cast %1 : vector<32xf32> to vector<32x1xf32>
    %cst_1 = arith.constant 3.200000e+01 : f32
    %3 = vector.broadcast %cst_1 : f32 to vector<32x1xf32>
    %4 = arith.divf %2, %3 : vector<32x1xf32>
    %5 = vector.broadcast %4 : vector<32x1xf32> to vector<32x32xf32>
    %6 = arith.subf %0, %5 : vector<32x32xf32>
    %7 = arith.mulf %6, %6 : vector<32x32xf32>
    %cst_2 = arith.constant dense<0.000000e+00> : vector<32xf32>
    %8 = vector.multi_reduction <add>, %7, %cst_2 [1] : vector<32x32xf32> to vector<32xf32>
    %9 = vector.shape_cast %8 : vector<32xf32> to vector<32x1xf32>
    %cst_3 = arith.constant 3.200000e+01 : f32
    %10 = vector.broadcast %cst_3 : f32 to vector<32x1xf32>
    %11 = arith.divf %9, %10 : vector<32x1xf32>
    %cst_4 = arith.constant 9.99999974E-6 : f32
    %12 = vector.broadcast %cst_4 : f32 to vector<32x1xf32>
    %13 = arith.addf %11, %12 : vector<32x1xf32>
    %14 = math.rsqrt %13 : vector<32x1xf32>
    %15 = vector.broadcast %14 : vector<32x1xf32> to vector<32x32xf32>
    %16 = arith.mulf %6, %15 : vector<32x32xf32>
    %c0_5 = arith.constant 0 : index
    %c0_6 = arith.constant 0 : index
    %17 = vector.load %arg3[%c0_5, %c0_6] : memref<1x32xf32, #tpu.memory_space<vmem>>, vector<1x32xf32>
    %18 = vector.broadcast %17 : vector<1x32xf32> to vector<32x32xf32>
    %19 = arith.mulf %16, %18 : vector<32x32xf32>
    %c0_7 = arith.constant 0 : index
    %c0_8 = arith.constant 0 : index
    %20 = vector.load %arg4[%c0_7, %c0_8] : memref<1x32xf32, #tpu.memory_space<vmem>>, vector<1x32xf32>
    %21 = vector.broadcast %20 : vector<1x32xf32> to vector<32x32xf32>
    %22 = arith.addf %19, %21 : vector<32x32xf32>
    %23 = arith.truncf %22 : vector<32x32xf32> to vector<32x32xbf16>
    %c0_9 = arith.constant 0 : index
    %c0_10 = arith.constant 0 : index
    %24 = vector.load %arg5[%c0_9, %c0_10] : memref<32x32xbf16, #tpu.memory_space<vmem>>, vector<32x32xbf16>
    %cst_11 = arith.constant dense<0.000000e+00> : vector<32x32xf32>
    %25 = tpu.matmul %23, %24, %cst_11 {dimension_numbers = #tpu.dot_dimension_numbers<[1], [0], [0], [1], [0, 0, 1, 1], [], []>} : vector<32x32xbf16>, vector<32x32xbf16>, vector<32x32xf32> -> vector<32x32xf32>
    %26 = arith.truncf %25 : vector<32x32xf32> to vector<32x32xbf16>
    %c0_12 = arith.constant 0 : index
    %c0_13 = arith.constant 0 : index
    %27 = vector.load %arg6[%c0_12, %c0_13] : memref<32x32xbf16, #tpu.memory_space<vmem>>, vector<32x32xbf16>
    tpu.vector_store %arg6[%c0_12, %c0_13], %26 {strides = array<i32>} : memref<32x32xbf16, #tpu.memory_space<vmem>>, vector<32x32xbf16>,
    return
  }
  func.func @transform_0(%arg0: i32, %arg1: i32) -> (i32, i32) {
    %c0_i32 = arith.constant 0 : i32
    %c0_i32_0 = arith.constant 0 : i32
    return %arg0, %c0_i32 : i32, i32
  }
  func.func @transform_1(%arg0: i32, %arg1: i32) -> (i32, i32) {
    %c0_i32 = arith.constant 0 : i32
    %c0_i32_0 = arith.constant 0 : i32
    %c0_i32_1 = arith.constant 0 : i32
    return %c0_i32, %c0_i32_0 : i32, i32
  }
  func.func @transform_2(%arg0: i32, %arg1: i32) -> (i32, i32) {
    %c0_i32 = arith.constant 0 : i32
    %c0_i32_0 = arith.constant 0 : i32
    %c0_i32_1 = arith.constant 0 : i32
    return %c0_i32, %c0_i32_0 : i32, i32
  }
  func.func @transform_3(%arg0: i32, %arg1: i32) -> (i32, i32) {
    %c0_i32 = arith.constant 0 : i32
    %c0_i32_0 = arith.constant 0 : i32
    return %c0_i32, %arg1 : i32, i32
  }
  func.func @transform_4(%arg0: i32, %arg1: i32) -> (i32, i32) {
    %c0_i32 = arith.constant 0 : i32
    return %arg0, %arg1 : i32, i32
  }
}

</mosaic_0001>

<bundles_post_ra>
// kernel: tpu_custom_call.1
= control target key start
LH: loop header
LB: loop body
LE: loop exit
PB: predicated region body
PF: predicated region fallthrough
CT: control target
= control target key end

     0   :  { %9 = vsyncpa [#allocation3], 0  ;;  %s478_s0 = inlined_call_operand.hbm [shape: f32[32,32], index: 0, kind: input, shape index: {}]   ;;  %s479_s1 = inlined_call_operand.hbm [shape: f32[1,32], index: 1, kind: input, shape index: {}]   ;;  %s480_s2 = inlined_call_operand.vmem [shape: f32[1,32], index: 2, kind: input, shape index: {}]   ;;  %s481_s3 = inlined_call_operand.hbm [shape: bf16[32,32], index: 3, kind: input, shape index: {}]   ;;  %s482_s4 = inlined_call_operand.hbm [shape: bf16[32,32], index: 4, kind: output, shape index: {}]  }
   0x1   :  { %10 = vsyncpa [#allocation6], 0  ;;  %s30_s17 = sshll.u32 %s479_s1, 4  ;;  %s31_s17 = int_to_ptr.hbm [resolvable:$true] %s30_s17 }
   0x2   :  { %11 = vsyncpa [#allocation4], 0  ;;  %s389_s18 = smov [#allocation5]   ;;  %s16_s22 = sshll.u32 %s478_s0, 4  ;;  %s17_s22 = int_to_ptr.hbm [resolvable:$true] %s16_s22 }
   0x3   :  { %s32_s19 = sshll.u32 %s389_s18, 4  ;;  %s390_s23 = smov [#allocation2]   ;;  %s33_s19 = int_to_ptr.vmem [resolvable:$true] %s32_s19 }
   0x4   :  { %35 = dma.hbm_to_vmem [thread:$0]  %s31_s17, 16, %s33_s19, [#allocation6]  }
   0x5   :  { %s18_s24 = sshll.u32 %s390_s23, 4  ;;  %s391_s25 = smov 128   ;;  %s19_s24 = int_to_ptr.vmem [resolvable:$true] %s18_s24 }
   0x6   :  { %s392_s26 = smov 8   ;;  %s42_s1 = sshll.u32 %s481_s3, 4  ;;  %s43_s1 = int_to_ptr.hbm [resolvable:$true] %s42_s1 }
   0x7   :  { %24 = dma.hbm_to_vmem [thread:$0]  %s17_s22, 512, %s19_s24, [#allocation3], %s391_s25, %s391_s25, %s392_s26  }
   0x8   :  { %s393_s29 = smov [#allocation7]   ;;  %s394_s5 = smov 64  }
   0x9   :  { %s44_s30 = sshll.u32 %s393_s29, 4  ;;  %s395_s6 = smov 4   ;;  %s45_s30 = int_to_ptr.vmem [resolvable:$true] %s44_s30 }
   0xa   :  { %50 = dma.hbm_to_vmem [thread:$0]  %s43_s1, 256, %s45_s30, [#allocation6], %s394_s5, %s394_s5, %s395_s6  }
   0xb   :  { %383 = dma.done.wait [#allocation3], 512  }
   0xc   :  { %384 = vsyncadd [#allocation3], 4294966784 }
   0xd   :  { %385 = dma.done.wait [#allocation6], 272  }
   0xe   :  { %386 = vsyncadd [#allocation6], 4294967024  ;;  %vm68_vm0 = vcmask 261120   ;;  %v66_v0 = vld [vmem:[#allocation2 + $0x10] sm:$0xff]  ;;  %v64_v1 = vld [vmem:[#allocation2] sm:$0xff]  ;;  %v396_v8 = vmov 32.0  }
   0xf   :  { %v75_v2 = vsel %vm68_vm0, %v66_v0, 0.0  ;;  %v69_v3 = vsel %vm68_vm0, %v64_v1, 0.0  ;;  %v67_v4 = vld [vmem:[#allocation2 + $0x18] sm:$0xff]  ;;  %v65_v5 = vld [vmem:[#allocation2 + $0x8] sm:$0xff]  ;;  %277 = vrcp.f32 %v396_v8  ;;  %vm227_vm14 = vcmask 257024   ;;  %s238_s10 = sshll.u32 %s482_s4, 4  ;;  %s239_s10 = int_to_ptr.hbm [resolvable:$true] %s238_s10 }
  0x10   :  { %76 = vadd.xlane.f32.xlu1 %v75_v2  ;;  %70 = vadd.xlane.f32.xlu0 %v69_v3  ;;  %v78_v6 = vsel %vm68_vm0, %v67_v4, 0.0  ;;  %v72_v7 = vsel %vm68_vm0, %v65_v5, 0.0  ;;  %v263_v35 = vld [vmem:[#allocation7 + $0x8] sm:$0xff]  ;;  %v262_v40 = vld [vmem:[#allocation7] sm:$0xff] }
  0x11   :  { %210 = vmatpush.bf16.msra.mxu0 %v263_v35  ;;  %264 = vmatpush.bf16.msra.mxu1 %v263_v35 }
  0x15   :  { %v278_v9 = vpop.eup %277  ;;  %211 = vmatpush.bf16.msra.mxu0 %v262_v40  ;;  %265 = vmatpush.bf16.msra.mxu1 %v262_v40 }
  0x16   :  { %v82_v10 = vmul.f32 32.0, %v278_v9  ;;  %vm86_vm1 = vweird.f32 %v278_v9 }
  0x18   :  { %79 = vadd.xlane.f32.xlu1 %v78_v6  ;;  %73 = vadd.xlane.f32.xlu0 %v72_v7  ;;  %v83_v11 = vsub.f32 1.0, %v82_v10  ;;  %v275_v10 = vld [vmem:[#allocation5] ss:$0 sm:$0xff] }
  0x1a   :  { %v84_v12 = vmul.f32 %v278_v9, %v83_v11 }
  0x1c   :  { %v85_v13 = vadd.f32 %v278_v9, %v84_v12 }
  0x1e   :  { %v87_v14 = vsel %vm86_vm1, %v278_v9, %v85_v13 }
  0x83   :  { %v77_v15 = vpop.xlane.xlu1 %76  ;;  %v71_v16 = vpop.xlane.xlu0 %70 }
  0x84   :  { %v90_v17 = vmul.f32 %v87_v14, %v77_v15  ;;  %v88_v18 = vmul.f32 %v87_v14, %v71_v16 }
  0x86   :  { %v439_v19 = vsub.f32 %v66_v0, %v90_v17  ;;  %v441_v20 = vsub.f32 %v64_v1, %v88_v18  ;;  %v276_v17 = vld [vmem:[%s480_s2] ss:$0 sm:$0xff]  ;;  %s397_s2 = smov [#allocation8]  }
  0x87   :  { %s236_s7 = sshll.u32 %s397_s2, 4  ;;  %s237_s7 = int_to_ptr.vmem [resolvable:$true] %s236_s7 }
  0x88   :  { %v98_v21 = vmul.f32 %v439_v19, %v439_v19  ;;  %v96_v22 = vmul.f32 %v441_v20, %v441_v20 }
  0x8a   :  { %v106_v23 = vsel %vm68_vm0, %v98_v21, 0.0  ;;  %v100_v24 = vsel %vm68_vm0, %v96_v22, 0.0 }
  0x8b   :  { %v80_v25 = vpop.xlane.xlu1 %79  ;;  %107 = vadd.xlane.f32.xlu0 %v106_v23  ;;  %101 = vadd.xlane.f32.xlu2 %v100_v24  ;;  %v74_v26 = vpop.xlane.xlu0 %73 }
  0x8c   :  { %v91_v27 = vmul.f32 %v87_v14, %v80_v25  ;;  %v89_v28 = vmul.f32 %v87_v14, %v74_v26 }
  0x8e   :  { %v449_v29 = vsub.f32 %v67_v4, %v91_v27  ;;  %v451_v30 = vsub.f32 %v65_v5, %v89_v28 }
  0x90   :  { %v99_v31 = vmul.f32 %v449_v29, %v449_v29  ;;  %v97_v32 = vmul.f32 %v451_v30, %v451_v30 }
  0x92   :  { %v109_v33 = vsel %vm68_vm0, %v99_v31, 0.0  ;;  %v103_v34 = vsel %vm68_vm0, %v97_v32, 0.0 }
  0x93   :  { %110 = vadd.xlane.f32.xlu1 %v109_v33  ;;  %104 = vadd.xlane.f32.xlu2 %v103_v34 }
  0xfe   :  { %v102_v36 = vpop.xlane.xlu2 %101  ;;  %v108_v37 = vpop.xlane.xlu0 %107 }
  0xff   :  { %v112_v38 = vmul.f32 %v102_v36, %v87_v14  ;;  %v114_v39 = vmul.f32 %v108_v37, %v87_v14 }
 0x101   :  { %v116_v41 = vadd.f32 1e-05, %v112_v38  ;;  %v118_v42 = vadd.f32 1e-05, %v114_v39 }
 0x103   :  { %279 = vrsqrt.f32 %v116_v41  ;;  %vm146_vm4 = vweird.f32 %v118_v42  ;;  %vm126_vm5 = vweird.f32 %v116_v41 }
 0x104   :  { %281 = vrsqrt.f32 %v118_v42 }
 0x106   :  { %v111_v43 = vpop.xlane.xlu1 %110  ;;  %v105_v44 = vpop.xlane.xlu2 %104 }
 0x107   :  { %v115_v45 = vmul.f32 %v111_v43, %v87_v14  ;;  %v113_v46 = vmul.f32 %v105_v44, %v87_v14 }
 0x109   :  { %v280_v47 = vpop.eup %279  ;;  %v119_v48 = vadd.f32 1e-05, %v115_v45  ;;  %v117_v49 = vadd.f32 1e-05, %v113_v46 }
 0x10a   :  { %v282_v50 = vpop.eup %281  ;;  %v121_v51 = vmul.f32 %v280_v47, %v116_v41  ;;  %vm127_vm3 = vweird.f32 %v280_v47 }
 0x10b   :  { %v141_v52 = vmul.f32 %v282_v50, %v118_v42  ;;  %283 = vrsqrt.f32 %v119_v48  ;;  %vm147_vm2 = vweird.f32 %v282_v50  ;;  %vm128_vm7 = vmor %vm126_vm5, %vm127_vm3  ;;  %vm156_vm10 = vweird.f32 %v119_v48 }
 0x10c   :  { %v122_v53 = vmul.f32 %v280_v47, %v121_v51  ;;  %285 = vrsqrt.f32 %v117_v49  ;;  %vm148_vm6 = vmor %vm146_vm4, %vm147_vm2  ;;  %vm136_vm12 = vweird.f32 %v117_v49 }
 0x10d   :  { %v142_v54 = vmul.f32 %v282_v50, %v141_v52 }
 0x10e   :  { %v123_v55 = vmul.f32 0.5, %v122_v53 }
 0x10f   :  { %v143_v56 = vmul.f32 0.5, %v142_v54 }
 0x110   :  { %v124_v57 = vsub.f32 1.5, %v123_v55 }
 0x111   :  { %v284_v58 = vpop.eup %283  ;;  %v144_v59 = vsub.f32 1.5, %v143_v56 }
 0x112   :  { %v286_v60 = vpop.eup %285  ;;  %v151_v61 = vmul.f32 %v284_v58, %v119_v48  ;;  %v125_v62 = vmul.f32 %v280_v47, %v124_v57  ;;  %vm157_vm8 = vweird.f32 %v284_v58 }
 0x113   :  { %v145_v63 = vmul.f32 %v282_v50, %v144_v59  ;;  %v131_v0 = vmul.f32 %v286_v60, %v117_v49  ;;  %vm137_vm9 = vweird.f32 %v286_v60  ;;  %vm158_vm11 = vmor %vm156_vm10, %vm157_vm8 }
 0x114   :  { %v152_v1 = vmul.f32 %v284_v58, %v151_v61  ;;  %v129_v5 = vsel %vm128_vm7, %v280_v47, %v125_v62  ;;  %vm138_vm13 = vmor %vm136_vm12, %vm137_vm9 }
 0x115   :  { %v132_v2 = vmul.f32 %v286_v60, %v131_v0  ;;  %v149_v3 = vsel %vm148_vm6, %v282_v50, %v145_v63  ;;  %v160_v11 = vmul.f32 %v129_v5, %v441_v20 }
 0x116   :  { %v153_v4 = vmul.f32 0.5, %v152_v1  ;;  %v162_v8 = vmul.f32 %v149_v3, %v439_v19 }
 0x117   :  { %v133_v6 = vmul.f32 0.5, %v132_v2  ;;  %v168_v21 = vmul.f32 %v275_v10, %v160_v11 }
 0x118   :  { %v154_v7 = vsub.f32 1.5, %v153_v4  ;;  %v170_v18 = vmul.f32 %v275_v10, %v162_v8 }
 0x119   :  { %v134_v9 = vsub.f32 1.5, %v133_v6  ;;  %v176_v25 = vadd.f32 %v276_v17, %v168_v21 }
 0x11a   :  { %v155_v12 = vmul.f32 %v284_v58, %v154_v7  ;;  %v178_v23 = vadd.f32 %v276_v17, %v170_v18 }
 0x11b   :  { %v135_v13 = vmul.f32 %v286_v60, %v134_v9 }
 0x11c   :  { %v159_v14 = vsel %vm158_vm11, %v284_v58, %v155_v12 }
 0x11d   :  { %v163_v15 = vmul.f32 %v159_v14, %v449_v29  ;;  %v139_v16 = vsel %vm138_vm13, %v286_v60, %v135_v13 }
 0x11e   :  { %v161_v19 = vmul.f32 %v139_v16, %v451_v30 }
 0x11f   :  { %v171_v22 = vmul.f32 %v275_v10, %v163_v15 }
 0x120   :  { %v169_v20 = vmul.f32 %v275_v10, %v161_v19 }
 0x121   :  { %v179_v24 = vadd.f32 %v276_v17, %v171_v22 }
 0x122   :  { %v177_v26 = vadd.f32 %v276_v17, %v169_v20 }
 0x123   :  { %v181_v27 = vpack.c.bf16 %v179_v24, %v178_v23 }
 0x124   :  { %v180_v28 = vpack.c.bf16 %v177_v26, %v176_v25 }
 0x125   :  { %261 = vmatmul.msk.bf16.vlgmr.msra.gmra.mxu1 %vm68_vm0, %v181_v27 }
 0x126   :  { %260 = vmatmul.msk.bf16.vlgmr.msra.gmra.mxu0 %vm68_vm0, %v180_v28 }
 0x1a2   :  { %v218_v29 = vpop.f32.mrf.mxu1 }
 0x1a3   :  { %v213_v31 = vpop.f32.mrf.mxu0  ;;  %v225_v32 = vpack.c.bf16 %v218_v29, %v218_v29 }
 0x1a4   :  { %v223_v33 = vpack.c.bf16 %v213_v31, %v213_v31 }
 0x1a5   :  { %230 = vst.msk [vmem:[#allocation8 + $0x8] sm:$0xf] %vm227_vm14, %v225_v32 }
 0x1a6   :  { %228 = vst.msk [vmem:[#allocation8] sm:$0xf] %vm227_vm14, %v223_v33 }
 0x1aa   :  { %v220_v30 = vpop.f32.mrf.mxu1 }
 0x1ab   :  { %v215_v34 = vpop.f32.mrf.mxu0  ;;  %v226_v35 = vpack.c.bf16 %v220_v30, %v220_v30 }
 0x1ac   :  { %v224_v36 = vpack.c.bf16 %v215_v34, %v215_v34 }
 0x1ad   :  { %231 = vst.msk [vmem:[#allocation8 + $0xc] sm:$0xf] %vm227_vm14, %v226_v35 }
 0x1ae   :  { %229 = vst.msk [vmem:[#allocation8 + $0x4] sm:$0xf] %vm227_vm14, %v224_v36 }
 0x1af   :  { %244 = dma.vmem_to_hbm [thread:$0]  %s237_s7, 256, %s239_s10, [#allocation4], %s394_s5, %s394_s5, %s395_s6  }
 0x1b0   :  { %387 = dma.done.wait [#allocation4], 256  }
 0x1b1   :  { %388 = vsyncadd [#allocation4], 4294967040 }
 0x1b2   :  { %249 = vsyncpa [#allocation3], 1 }
 0x1b3   :  { %250 = vsyncpa [#allocation6], 1 }
 0x1b4   :  { %251 = vsyncpa [#allocation4], 1 }

</bundles_post_ra>
